<compile_context>
chip_gen: v7x
topology: tpu7x:2x2x1
jax: 0.10.0
libtpu: 0.0.40
codegen_flags: <defaults>
</compile_context>

<pallas_src>
import functools

import jax
import jax.numpy as jnp
from jax.experimental import pallas as pl
from jax.experimental.pallas import tpu as pltpu

LANE = 128
_VMEM_LIMIT = 48 * 1024 * 1024  # < 64 MiB physical on v7x, generous on v5e/v6e


def _round_up(x, m):
    return ((x + m - 1) // m) * m


# --------------------------- tiled matmul kernel -----------------------------

def _matmul_bias_act_kernel(a_ref, b_ref, bias_ref, o_ref, *, act):
    # bf16 MXU operands, f32 accumulation; epilogue stays in f32 (v5e VPU/EUP
    # have no bf16 elementwise path).
    acc = jnp.dot(a_ref[...], b_ref[...], preferred_element_type=jnp.float32)
    acc = acc + bias_ref[...]
    if act == "relu":
        acc = jnp.maximum(acc, 0.0)
    o_ref[...] = acc.astype(o_ref.dtype)


def matmul_bias_act(a, b, bias, act="none", out_dtype=jnp.float32,
                    keep_padded_n=False, tile_m=256):
    """(M,K) @ (K,N) + bias with optional ReLU on the MXU.

    K and N are zero-padded to multiples of 128 so contraction / store axes are
    lane-dense (unmasked vst); M is tiled and the grid axis marked 'parallel'.
    """
    M, K = a.shape
    K2, N = b.shape
    assert K == K2
    Kp = _round_up(K, LANE)
    Np = _round_up(N, LANE)
    if M > tile_m:
        Mp = _round_up(M, tile_m)
        tm = tile_m
    else:
        Mp = _round_up(M, 16)
        tm = Mp

    a_p = jnp.zeros((Mp, Kp), jnp.bfloat16).at[:M, :K].set(a.astype(jnp.bfloat16))
    b_p = jnp.zeros((Kp, Np), jnp.bfloat16).at[:K, :N].set(b.astype(jnp.bfloat16))
    bias_p = jnp.zeros((1, Np), jnp.float32).at[:, :N].set(
        bias.reshape(1, N).astype(jnp.float32))

    out_itemsize = jnp.dtype(out_dtype).itemsize
    cost = pl.CostEstimate(
        flops=2 * Mp * Kp * Np,
        transcendentals=0,
        bytes_accessed=2 * (Mp * Kp + Kp * Np) + 4 * Np + out_itemsize * Mp * Np)

    out = pl.pallas_call(
        functools.partial(_matmul_bias_act_kernel, act=act),
        out_shape=jax.ShapeDtypeStruct((Mp, Np), out_dtype),
        grid=(Mp // tm,),
        in_specs=[
            pl.BlockSpec((tm, Kp), lambda i: (i, 0)),
            pl.BlockSpec((Kp, Np), lambda i: (0, 0)),
            pl.BlockSpec((1, Np), lambda i: (0, 0)),
        ],
        out_specs=pl.BlockSpec((tm, Np), lambda i: (i, 0)),
        compiler_params=pltpu.CompilerParams(
            dimension_semantics=("parallel",),
            vmem_limit_bytes=_VMEM_LIMIT),
        cost_estimate=cost,
    )(a_p, b_p, bias_p)
    # TODO(synk): add a K grid axis + f32 VMEM accumulator once K grows past a
    # few thousand; at these sizes a single K block fits VMEM comfortably.
    if keep_padded_n:
        return out[:M, :]
    return out[:M, :N]


# ------------------------ fused seg-head kernel -------------------------------

def _seg_head_fused_kernel(q_ref, mem_ref, wq_ref, bq_ref, wkv_ref, bkv_ref,
                           wo_ref, bo_ref, wh_ref, bh_ref, mf_ref,
                           logits_ref, masks_ref, *, scale, dp, l_valid):
    f32 = jnp.float32
    bf16 = jnp.bfloat16

    queries = q_ref[...]                                              # (Q, Dp) f32
    qp = jnp.dot(queries.astype(bf16), wq_ref[...],
                 preferred_element_type=f32) + bq_ref[...]            # (Q, Dp)

    mem = mem_ref[0]                                                  # (Lp, Dp) bf16
    kv = jnp.dot(mem, wkv_ref[...],
                 preferred_element_type=f32) + bkv_ref[...]           # (Lp, 2Dp)
    k = kv[:, :dp].astype(bf16)
    v = kv[:, dp:].astype(bf16)

    s = jax.lax.dot_general(qp.astype(bf16), k, (((1,), (1,)), ((), ())),
                            preferred_element_type=f32) * scale       # (Q, Lp)
    col = jax.lax.broadcasted_iota(jnp.int32, s.shape, 1)
    s = jnp.where(col < l_valid, s, -1e30)                            # mask L padding
    m = jnp.max(s, axis=-1, keepdims=True)
    p = jnp.exp(s - m)
    denom = jnp.sum(p, axis=-1, keepdims=True)
    attn = jnp.dot(p.astype(bf16), v, preferred_element_type=f32)
    attn = attn * pl.reciprocal(denom, approx=True)                   # EUP slot

    out = jnp.dot(attn.astype(bf16), wo_ref[...],
                  preferred_element_type=f32) + bo_ref[...] + queries  # residual

    heads = jnp.dot(out.astype(bf16), wh_ref[...],
                    preferred_element_type=f32) + bh_ref[...]          # (Q, 2Dp)
    mask_embed = heads[:, :dp].astype(bf16)
    logits_ref[0] = heads[:, dp:]                                      # lane-dense

    mf = mf_ref[0]                                                     # (L1p, Dp)
    masks_ref[0] = jax.lax.dot_general(
        mask_embed, mf, (((1,), (1,)), ((), ())), preferred_element_type=f32)


def seg_head_fused(query_embed_p, memory, mask_feats, params, *, d_true, l_valid):
    B, Lp, Dp = memory.shape
    _, L1p, _ = mask_feats.shape
    Q = query_embed_p.shape[0]
    w_q, b_q, w_kv, b_kv, w_o, b_o, w_h, b_h = params
    kernel = functools.partial(
        _seg_head_fused_kernel, scale=1.0 / float(d_true) ** 0.5,
        dp=Dp, l_valid=l_valid)
    return pl.pallas_call(
        kernel,
        out_shape=(jax.ShapeDtypeStruct((B, Q, Dp), jnp.float32),
                   jax.ShapeDtypeStruct((B, Q, L1p), jnp.float32)),
        grid=(B,),
        in_specs=[
            pl.BlockSpec((Q, Dp), lambda b: (0, 0)),              # queries
            pl.BlockSpec((1, Lp, Dp), lambda b: (b, 0, 0)),       # memory
            pl.BlockSpec((Dp, Dp), lambda b: (0, 0)),             # w_q
            pl.BlockSpec((1, Dp), lambda b: (0, 0)),              # b_q
            pl.BlockSpec((Dp, 2 * Dp), lambda b: (0, 0)),         # [w_k | w_v]
            pl.BlockSpec((1, 2 * Dp), lambda b: (0, 0)),          # [b_k | b_v]
            pl.BlockSpec((Dp, Dp), lambda b: (0, 0)),             # w_o
            pl.BlockSpec((1, Dp), lambda b: (0, 0)),              # b_o
            pl.BlockSpec((Dp, 2 * Dp), lambda b: (0, 0)),         # [w_mask | w_cls]
            pl.BlockSpec((1, 2 * Dp), lambda b: (0, 0)),          # [b_mask | b_cls]
            pl.BlockSpec((1, L1p, Dp), lambda b: (b, 0, 0)),      # mask features
        ],
        out_specs=(pl.BlockSpec((1, Q, Dp), lambda b: (b, 0, 0)),
                   pl.BlockSpec((1, Q, L1p), lambda b: (b, 0, 0))),
        compiler_params=pltpu.CompilerParams(
            dimension_semantics=("parallel",),
            vmem_limit_bytes=_VMEM_LIMIT),
    )(query_embed_p, memory, w_q, b_q, w_kv, b_kv, w_o, b_o, w_h, b_h, mask_feats)


# ------------------------------ conv via im2col ------------------------------

def conv2d_nhwc(x, w, b, stride, act="relu", out_dtype=jnp.bfloat16):
    """kxk conv (padding k//2, stride s); the matmul runs on the MXU in Pallas.

    TODO(synk): replace the wrapper-side im2col with in-kernel tap accumulation
    (kh*kw shifted matmuls over a VMEM tile) to avoid the ~9x HBM blow-up at
    real resolutions; patches are kept in bf16 here to halve the traffic.
    """
    B, H, W, Cin = x.shape
    kh, kw, _, Cout = w.shape
    ph, pw = kh // 2, kw // 2
    Ho, Wo = H // stride, W // stride
    xp = jnp.pad(x.astype(jnp.bfloat16), ((0, 0), (ph, ph), (pw, pw), (0, 0)))
    cols = [xp[:, i:i + Ho * stride:stride, j:j + Wo * stride:stride, :]
            for i in range(kh) for j in range(kw)]
    patches = jnp.concatenate(cols, axis=-1)          # (B, Ho, Wo, kh*kw*Cin) bf16
    out = matmul_bias_act(patches.reshape(B * Ho * Wo, kh * kw * Cin),
                          w.reshape(kh * kw * Cin, Cout), b, act=act,
                          out_dtype=out_dtype)
    return out.reshape(B, Ho, Wo, Cout)


# --------------------------------- model -------------------------------------

class UniASPallas:
    """Pallas re-implementation of the UniAS forward pass."""

    def __init__(self, key, *, in_channels=4, num_queries=8, hidden_dim=32,
                 num_classes=2, num_cls_tokens=4):
        c1, c2 = 16, 32
        keys = jax.random.split(key, 16)

        def init(k, shape, scale=0.05):
            return scale * jax.random.normal(k, shape, dtype=jnp.float32)

        # ---- backbone ----
        self.w_conv1 = init(keys[0], (3, 3, in_channels, c1))
        self.b_conv1 = jnp.zeros((c1,), jnp.float32)
        self.w_conv2 = init(keys[1], (3, 3, c1, c2))
        self.b_conv2 = jnp.zeros((c2,), jnp.float32)
        self.cls_noise_scale = 0.1 + 0.05 * jnp.arange(num_cls_tokens, dtype=jnp.float32)
        # TODO(synk): noise key fixed at construction => identical noise each
        # forward; pass rng= to forward() for fresh noise per training step.
        self.noise_key = keys[2]

        # ---- seg head (true-size parameters) ----
        D = hidden_dim
        Dp = _round_up(D, LANE)
        C1 = num_classes + 1
        self.hidden_dim = D
        self.dp = Dp
        self.num_queries = num_queries
        self.num_classes = num_classes
        self.w_proj1 = init(keys[3], (c1, D)); self.b_proj1 = jnp.zeros((D,), jnp.float32)
        self.w_proj2 = init(keys[4], (c2, D)); self.b_proj2 = jnp.zeros((D,), jnp.float32)
        self.w_maskproj = init(keys[5], (c1, D)); self.b_maskproj = jnp.zeros((D,), jnp.float32)
        self.query_embed = init(keys[6], (num_queries, D), scale=0.5)
        self.w_q = init(keys[7], (D, D)); self.b_q = jnp.zeros((D,), jnp.float32)
        self.w_k = init(keys[8], (D, D)); self.b_k = jnp.zeros((D,), jnp.float32)
        self.w_v = init(keys[9], (D, D)); self.b_v = jnp.zeros((D,), jnp.float32)
        self.w_o = init(keys[10], (D, D)); self.b_o = jnp.zeros((D,), jnp.float32)
        self.w_cls = init(keys[11], (D, C1)); self.b_cls = jnp.zeros((C1,), jnp.float32)
        self.w_mask = init(keys[12], (D, D)); self.b_mask = jnp.zeros((D,), jnp.float32)

        # ---- lane-padded (Dp=128) / fused weights for the fused seg-head kernel
        def pad_w(w):
            return jnp.zeros((Dp, Dp), jnp.float32).at[:w.shape[0], :w.shape[1]].set(w)

        def pad_b(b):
            return jnp.zeros((1, Dp), jnp.float32).at[0, :b.shape[0]].set(b)

        self.query_embed_p = (jnp.zeros((num_queries, Dp), jnp.float32)
                              .at[:, :D].set(self.query_embed))
        self.w_q_p = pad_w(self.w_q).astype(jnp.bfloat16)
        self.b_q_p = pad_b(self.b_q)
        # fused [w_k | w_v]: one memory projection matmul inside the kernel
        w_kv = (jnp.zeros((Dp, 2 * Dp), jnp.float32)
                .at[:D, :D].set(self.w_k).at[:D, Dp:Dp + D].set(self.w_v))
        self.w_kv_p = w_kv.astype(jnp.bfloat16)
        self.b_kv_p = (jnp.zeros((1, 2 * Dp), jnp.float32)
                       .at[0, :D].set(self.b_k).at[0, Dp:Dp + D].set(self.b_v))
        self.w_o_p = pad_w(self.w_o).astype(jnp.bfloat16)
        self.b_o_p = pad_b(self.b_o)
        # fused [w_mask | w_cls]: mask embed + class logits in one matmul
        w_h = (jnp.zeros((Dp, 2 * Dp), jnp.float32)
               .at[:D, :D].set(self.w_mask).at[:D, Dp:Dp + C1].set(self.w_cls))
        self.w_heads_p = w_h.astype(jnp.bfloat16)
        self.b_heads_p = (jnp.zeros((1, 2 * Dp), jnp.float32)
                          .at[0, :D].set(self.b_mask).at[0, Dp:Dp + C1].set(self.b_cls))

        self.strides = [2, 4]
        self.size_divisibility = True

    # -- backbone: (features, noised_features), both dicts of NHWC tensors --
    def backbone_fwd(self, x_nchw, clsidx, training, rng=None):
        x = jnp.transpose(x_nchw, (0, 2, 3, 1)).astype(jnp.float32)  # NCHW -> NHWC
        f1 = conv2d_nhwc(x, self.w_conv1, self.b_conv1, stride=2)    # (B,H/2,W/2,16)
        f2 = conv2d_nhwc(f1, self.w_conv2, self.b_conv2, stride=2)   # (B,H/4,W/4,32)
        features = {"res2": f1, "res3": f2}
        if training:
            scale = self.cls_noise_scale[clsidx]
            rng = self.noise_key if rng is None else rng
            k1, k2 = jax.random.split(rng)
            noised = {
                "res2": f1.astype(jnp.float32)
                        + scale * jax.random.normal(k1, f1.shape, jnp.float32),
                "res3": f2.astype(jnp.float32)
                        + scale * jax.random.normal(k2, f2.shape, jnp.float32),
            }
        else:
            noised = features
        return features, noised

    # -- seg head: mask-classification outputs --
    def seg_head_fwd(self, noised_features, features):
        D, Dp, Q = self.hidden_dim, self.dp, self.num_queries
        f1, f2 = features["res2"], features["res3"]
        B = f1.shape[0]

        # per-level projections -> lane-dense (B, L_i, Dp) bf16 memory
        m1 = matmul_bias_act(f1.reshape(-1, f1.shape[-1]), self.w_proj1, self.b_proj1,
                             out_dtype=jnp.bfloat16, keep_padded_n=True
                             ).reshape(B, -1, Dp)
        m2 = matmul_bias_act(f2.reshape(-1, f2.shape[-1]), self.w_proj2, self.b_proj2,
                             out_dtype=jnp.bfloat16, keep_padded_n=True
                             ).reshape(B, -1, Dp)
        memory = jnp.concatenate([m1, m2], axis=1)            # (B, L, Dp)
        L = memory.shape[1]
        Lp = _round_up(L, 16)
        if Lp != L:
            memory = jnp.pad(memory, ((0, 0), (0, Lp - L), (0, 0)))

        # mask features from the highest-resolution noised map; pad L1 to a
        # multiple of 128 so the pred_masks store axis is lane-dense.
        nf1 = noised_features["res2"]
        Hm, Wm = nf1.shape[1], nf1.shape[2]
        L1 = Hm * Wm
        mask_feats = matmul_bias_act(nf1.reshape(-1, nf1.shape[-1]), self.w_maskproj,
                                     self.b_maskproj, out_dtype=jnp.bfloat16,
                                     keep_padded_n=True).reshape(B, L1, Dp)
        L1p = _round_up(L1, LANE)
        if L1p != L1:
            mask_feats = jnp.pad(mask_feats, ((0, 0), (0, L1p - L1), (0, 0)))

        params = (self.w_q_p, self.b_q_p, self.w_kv_p, self.b_kv_p,
                  self.w_o_p, self.b_o_p, self.w_heads_p, self.b_heads_p)
        logits_pad, masks_pad = seg_head_fused(
            self.query_embed_p, memory, mask_feats, params, d_true=D, l_valid=L)

        pred_logits = logits_pad[:, :, :self.num_classes + 1]
        pred_masks = masks_pad[:, :, :L1].reshape(B, Q, Hm, Wm)
        return {"pred_logits": pred_logits, "pred_masks": pred_masks}

    # -- mirrors UniAS.forward control flow --
    def forward(self, batched_inputs, training=True, rng=None):
        if not isinstance(batched_inputs, dict):
            clsidx = 0
            features, noised = self.backbone_fwd(batched_inputs, clsidx, training, rng)
            return self.seg_head_fwd(noised, features)
        shape = batched_inputs["image"].shape[-2:]
        if self.size_divisibility:
            assert shape[0] % max(self.strides) == 0 and shape[1] % max(self.strides) == 0, \
                "size_divisibility on, but img size is not divisible by stride"
        input_data = batched_inputs["image"]
        clsidx = batched_inputs["clsidx"]
        features, noised = self.backbone_fwd(input_data, clsidx, training, rng)
        return self.seg_head_fwd(noised, features)


# --------------------------------- driver ------------------------------------

if __name__ == "__main__":
    key = jax.random.PRNGKey(0)
    pkey, xkey = jax.random.split(key)
    model = UniASPallas(pkey)

    # NCHW image input, matching the PyTorch convention: batch=2, C=4, 16x16
    x = jax.random.normal(xkey, (2, 4, 16, 16), dtype=jnp.float32)
    batched_inputs = {"image": x, "clsidx": 0}

    outputs = model.forward(batched_inputs, training=True)
    outputs = jax.block_until_ready(outputs)

    assert outputs["pred_logits"].shape == (2, 8, 3)
    assert outputs["pred_masks"].shape == (2, 8, 8, 8)
    assert bool(jnp.all(jnp.isfinite(outputs["pred_logits"])))
    assert bool(jnp.all(jnp.isfinite(outputs["pred_masks"])))
    print("KERNEL_OK")
</pallas_src>

<mosaic_0001>
module attributes {stable_mosaic.version = 11 : i64} {
  func.func @_matmul_bias_act_kernel(%arg0: i32, %arg1: memref<128x128xbf16, #tpu.memory_space<vmem>>, %arg2: memref<128x128xbf16, #tpu.memory_space<vmem>>, %arg3: memref<1x128xf32, #tpu.memory_space<vmem>>, %arg4: memref<128x128xbf16, #tpu.memory_space<vmem>>) attributes {dimension_semantics = [#tpu.dimension_semantics<parallel>], iteration_bounds = array<i64: 1>, scalar_prefetch = 0 : i64, scratch_operands = 0 : i64, tpu.core_type = #tpu.core_type<tc>, window_params = [{transform_indices = @transform_0, window_bounds = array<i64: 128, 128>}, {pipeline_mode = #tpu.pipeline_mode<synchronous>, transform_indices = @transform_1, window_bounds = array<i64: 128, 128>}, {pipeline_mode = #tpu.pipeline_mode<synchronous>, transform_indices = @transform_2, window_bounds = array<i64: 1, 128>}, {transform_indices = @transform_3, window_bounds = array<i64: 128, 128>}]} {
    %c0 = arith.constant 0 : index
    %c0_0 = arith.constant 0 : index
    %0 = vector.load %arg1[%c0, %c0_0] : memref<128x128xbf16, #tpu.memory_space<vmem>>, vector<128x128xbf16>
    %c0_1 = arith.constant 0 : index
    %c0_2 = arith.constant 0 : index
    %1 = vector.load %arg2[%c0_1, %c0_2] : memref<128x128xbf16, #tpu.memory_space<vmem>>, vector<128x128xbf16>
    %cst = arith.constant dense<0.000000e+00> : vector<128x128xf32>
    %2 = tpu.matmul %0, %1, %cst {dimension_numbers = #tpu.dot_dimension_numbers<[1], [0], [0], [1], [0, 0, 1, 1], [], []>} : vector<128x128xbf16>, vector<128x128xbf16>, vector<128x128xf32> -> vector<128x128xf32>
    %c0_3 = arith.constant 0 : index
    %c0_4 = arith.constant 0 : index
    %3 = vector.load %arg3[%c0_3, %c0_4] : memref<1x128xf32, #tpu.memory_space<vmem>>, vector<1x128xf32>
    %4 = vector.broadcast %3 : vector<1x128xf32> to vector<128x128xf32>
    %5 = arith.addf %2, %4 : vector<128x128xf32>
    %cst_5 = arith.constant 0.000000e+00 : f32
    %6 = vector.broadcast %cst_5 : f32 to vector<128x128xf32>
    %7 = arith.maximumf %5, %6 : vector<128x128xf32>
    %8 = arith.truncf %7 : vector<128x128xf32> to vector<128x128xbf16>
    %c0_6 = arith.constant 0 : index
    %c0_7 = arith.constant 0 : index
    %9 = vector.load %arg4[%c0_6, %c0_7] : memref<128x128xbf16, #tpu.memory_space<vmem>>, vector<128x128xbf16>
    tpu.vector_store %arg4[%c0_6, %c0_7], %8 {strides = array<i32>} : memref<128x128xbf16, #tpu.memory_space<vmem>>, vector<128x128xbf16>,
    return
  }
  func.func @transform_0(%arg0: i32) -> (i32, i32) {
    %c0_i32 = arith.constant 0 : i32
    %c0_i32_0 = arith.constant 0 : i32
    return %arg0, %c0_i32 : i32, i32
  }
  func.func @transform_1(%arg0: i32) -> (i32, i32) {
    %c0_i32 = arith.constant 0 : i32
    %c0_i32_0 = arith.constant 0 : i32
    %c0_i32_1 = arith.constant 0 : i32
    return %c0_i32, %c0_i32_0 : i32, i32
  }
  func.func @transform_2(%arg0: i32) -> (i32, i32) {
    %c0_i32 = arith.constant 0 : i32
    %c0_i32_0 = arith.constant 0 : i32
    %c0_i32_1 = arith.constant 0 : i32
    return %c0_i32, %c0_i32_0 : i32, i32
  }
  func.func @transform_3(%arg0: i32) -> (i32, i32) {
    %c0_i32 = arith.constant 0 : i32
    %c0_i32_0 = arith.constant 0 : i32
    return %arg0, %c0_i32 : i32, i32
  }
}

</mosaic_0001>

<bundles_post_ra>
// kernel: tpu_custom_call.1
= control target key start
LH: loop header
LB: loop body
LE: loop exit
PB: predicated region body
PF: predicated region fallthrough
CT: control target
= control target key end

     0   :  { %8 = vsyncpa [#allocation3], 0  ;;  %s716_s0 = inlined_call_operand.hbm [shape: bf16[128,128], index: 0, kind: input, shape index: {}]   ;;  %s717_s1 = inlined_call_operand.hbm [shape: bf16[128,128], index: 1, kind: input, shape index: {}]   ;;  %s718_s2 = inlined_call_operand.vmem [shape: f32[1,128], index: 2, kind: input, shape index: {}]   ;;  %s719_s3 = inlined_call_operand.hbm [shape: bf16[128,128], index: 3, kind: output, shape index: {}]  }
   0x1   :  { %9 = vsyncpa [#allocation6], 0 }
   0x2   :  { %10 = vsyncpa [#allocation4], 0  ;;  %s643_s12 = smov [#allocation2]   ;;  %s571_s16 = scalar_lea.hbm %s716_s0, 1024 }
   0x3   :  { %s16_s13 = sshll.u32 %s643_s12, 4  ;;  %p572_p0 = scmp.ne.s32.totalorder %s716_s0, %s571_s16  ;;  %s17_s13 = int_to_ptr.vmem [resolvable:$true] %s16_s13 }
   0x4   :  { %p575_p1 = scmp.lt.u32.totalorder %s571_s16, %s716_s0 }
   0x6   :  { %p577_p2 = pnand %p575_p1, %p572_p0 }
   0x8   :  { %580 = shalt.err (!%p577_p2)
}
   0x9   :  { %s581_s21 = scalar_lea.vmem %s17_s13, 1024  ;;  %p586_p4 = scmp.lt.s32.totalorder %s17_s13, %s17_s13 }
   0xa   :  { %p582_p3 = scmp.ne.s32.totalorder %s17_s13, %s581_s21  ;;  %p587_p5 = scmp.lt.s32.totalorder %s581_s21, %s581_s21 }
   0xc   :  { %p588_p6 = por %p587_p5, %p586_p4 }
   0xe   :  { %p589_p7 = pnand %p588_p6, %p582_p3 }
  0x10   :  { %592 = shalt.err (!%p589_p7)
}
  0x11   :  { %s644_s22 = smov 64   ;;  %s645_s23 = smov 4  }
  0x12   :  { %22 = dma.hbm_to_vmem [thread:$0]  %s716_s0, 1024, %s17_s13, [#allocation3], %s644_s22, %s644_s22, %s645_s23  }
  0x13   :  { %s646_s26 = smov [#allocation5]   ;;  %s593_s30 = scalar_lea.hbm %s717_s1, 1024 }
  0x14   :  { %s28_s27 = sshll.u32 %s646_s26, 4  ;;  %p594_p8 = scmp.ne.s32.totalorder %s717_s1, %s593_s30  ;;  %s29_s27 = int_to_ptr.vmem [resolvable:$true] %s28_s27 }
  0x15   :  { %p597_p9 = scmp.lt.u32.totalorder %s593_s30, %s717_s1 }
  0x17   :  { %p599_p10 = pnand %p597_p9, %p594_p8 }
  0x19   :  { %602 = shalt.err (!%p599_p10)
}
  0x1a   :  { %s603_s8 = scalar_lea.vmem %s29_s27, 1024  ;;  %p608_p12 = scmp.lt.s32.totalorder %s29_s27, %s29_s27 }
  0x1b   :  { %p604_p11 = scmp.ne.s32.totalorder %s29_s27, %s603_s8  ;;  %p609_p13 = scmp.lt.s32.totalorder %s603_s8, %s603_s8 }
  0x1d   :  { %p610_p0 = por %p609_p13, %p608_p12 }
  0x1f   :  { %p611_p1 = pnand %p610_p0, %p604_p11 }
  0x21   :  { %614 = shalt.err (!%p611_p1)
}
  0x22   :  { %34 = dma.hbm_to_vmem [thread:$0]  %s717_s1, 1024, %s29_s27, [#allocation6], %s644_s22, %s644_s22, %s645_s23  }
  0x23   :  { %637 = dma.done.wait [#allocation3], 1024  }
  0x24   :  { %638 = vsyncadd [#allocation3], 4294966272 }
  0x25   :  { %639 = dma.done.wait [#allocation6], 1024  }
  0x26   :  { %640 = vsyncadd [#allocation6], 4294966272  ;;  %v555_v0 = vld [vmem:[#allocation5] sm:$0xff]   ;;  %v556_v1 = vld [vmem:[#allocation5 + $0x8] sm:$0xff]  }
  0x27   :  { %502 = vmatprep.subr.bf16.mxu0 %v555_v0  ;;  %534 = vmatprep.subr.bf16.mxu1 %v555_v0  ;;  %v557_v2 = vld [vmem:[#allocation5 + $0x10] sm:$0xff]   ;;  %v558_v3 = vld [vmem:[#allocation5 + $0x18] sm:$0xff]   ;;  %v563_v4 = vld [vmem:[#allocation2] sm:$0xff]  }
  0x28   :  { %503 = vmatpush3.bf16.msra.mxu0 %v555_v0  ;;  %542 = vmatpush3.bf16.msra.mxu1 %v555_v0  ;;  %v564_v5 = vld [vmem:[#allocation2 + $0x20] sm:$0xff]   ;;  %v560_v7 = vld [vmem:[#allocation5 + $0x28] sm:$0xff]   ;;  %v561_v8 = vld [vmem:[#allocation5 + $0x30] sm:$0xff]  }
  0x29   :  { %504 = vmatprep.subr.bf16.mxu0 %v556_v1  ;;  %535 = vmatprep.subr.bf16.mxu1 %v556_v1  ;;  %v559_v6 = vld [vmem:[#allocation5 + $0x20] sm:$0xff]   ;;  %v562_v9 = vld [vmem:[#allocation5 + $0x38] sm:$0xff]   ;;  %v565_v10 = vld [vmem:[#allocation2 + $0x8] sm:$0xff]  }
  0x2a   :  { %518 = vmatprep.mubr.bf16.mxu0 %v563_v4  ;;  %526 = vmatprep.mubr.bf16.mxu1 %v564_v5  ;;  %v566_v11 = vld [vmem:[#allocation2 + $0x28] sm:$0xff]   ;;  %v567_v12 = vld [vmem:[#allocation2 + $0x10] sm:$0xff]   ;;  %v569_v14 = vld [vmem:[#allocation2 + $0x18] sm:$0xff]  }
  0x2b   :  { %v568_v13 = vld [vmem:[#allocation2 + $0x30] sm:$0xff]   ;;  %v570_v15 = vld [vmem:[#allocation2 + $0x38] sm:$0xff]   ;;  %v390_v16 = vld [vmem:[%s718_s2] ss:$0 sm:$0xff]  ;;  %s647_s2 = smov [#allocation7]  }
  0x2c   :  { %505 = vmatpush3.bf16.msra.mxu0 %v556_v1  ;;  %543 = vmatpush3.bf16.msra.mxu1 %v556_v1  ;;  %s377_s11 = sshll.u32 %s647_s2, 4  ;;  %s378_s11 = int_to_ptr.vmem [resolvable:$true] %s377_s11 }
  0x2d   :  { %506 = vmatprep.subr.bf16.mxu0 %v557_v2  ;;  %536 = vmatprep.subr.bf16.mxu1 %v557_v2  ;;  %s615_s12 = scalar_lea.vmem %s378_s11, 1024  ;;  %p620_p3 = scmp.lt.s32.totalorder %s378_s11, %s378_s11 }
  0x2e   :  { %p616_p2 = scmp.ne.s32.totalorder %s378_s11, %s615_s12  ;;  %p621_p4 = scmp.lt.s32.totalorder %s615_s12, %s615_s12 }
  0x30   :  { %507 = vmatpush3.bf16.msra.mxu0 %v557_v2  ;;  %544 = vmatpush3.bf16.msra.mxu1 %v557_v2  ;;  %p622_p5 = por %p621_p4, %p620_p3 }
  0x31   :  { %508 = vmatprep.subr.bf16.mxu0 %v558_v3  ;;  %537 = vmatprep.subr.bf16.mxu1 %v558_v3 }
  0x32   :  { %p623_p6 = pnand %p622_p5, %p616_p2 }
  0x34   :  { %509 = vmatpush3.bf16.msra.mxu0 %v558_v3  ;;  %545 = vmatpush3.bf16.msra.mxu1 %v558_v3 }
  0x35   :  { %510 = vmatprep.subr.bf16.mxu0 %v559_v6  ;;  %538 = vmatprep.subr.bf16.mxu1 %v559_v6 }
  0x38   :  { %511 = vmatpush3.bf16.msra.mxu0 %v559_v6  ;;  %546 = vmatpush3.bf16.msra.mxu1 %v559_v6 }
  0x39   :  { %512 = vmatprep.subr.bf16.mxu0 %v560_v7  ;;  %539 = vmatprep.subr.bf16.mxu1 %v560_v7 }
  0x3c   :  { %513 = vmatpush3.bf16.msra.mxu0 %v560_v7  ;;  %547 = vmatpush3.bf16.msra.mxu1 %v560_v7 }
  0x3d   :  { %514 = vmatprep.subr.bf16.mxu0 %v561_v8  ;;  %540 = vmatprep.subr.bf16.mxu1 %v561_v8 }
  0x40   :  { %515 = vmatpush3.bf16.msra.mxu0 %v561_v8  ;;  %548 = vmatpush3.bf16.msra.mxu1 %v561_v8 }
  0x41   :  { %516 = vmatprep.subr.bf16.mxu0 %v562_v9  ;;  %541 = vmatprep.subr.bf16.mxu1 %v562_v9 }
  0x44   :  { %517 = vmatpush3.bf16.msra.mxu0 %v562_v9  ;;  %549 = vmatpush3.bf16.msra.mxu1 %v562_v9 }
  0x47   :  { %519 = vmatmul.mubr.bf16.vlgmr.msra.gmra.mrb[0].mxu0 %v565_v10  ;;  %527 = vmatmul.mubr.bf16.vlgmr.msra.gmra.mrb[0].mxu1 %v566_v11 }
  0x48   :  { %522 = vmatprep.mubr.bf16.mxu0 %v567_v12  ;;  %530 = vmatprep.mubr.bf16.mxu1 %v568_v13 }
  0x4f   :  { %523 = vmatmul.mubr.bf16.gmra.mrb[4].mxu0 %v569_v14  ;;  %531 = vmatmul.mubr.bf16.gmra.mrb[4].mxu1 %v570_v15 }
 0x11a   :  { %v520_v17 = vpop.f32.mrb[0].mxu0  ;;  %v528_v18 = vpop.f32.mrb[0].mxu1 }
 0x11b   :  { %v222_v19 = vadd.f32 %v520_v17, %v390_v16  ;;  %v254_v20 = vadd.f32 %v528_v18, %v390_v16  ;;  %v213_v21 = vpop.f32.mrb[1].mxu0  ;;  %v245_v22 = vpop.f32.mrb[1].mxu1 }
 0x11c   :  { %v214_v23 = vadd.f32 %v390_v16, %v213_v21  ;;  %v246_v24 = vadd.f32 %v390_v16, %v245_v22  ;;  %v521_v25 = vpop.f32.mrb[2].mxu0  ;;  %v529_v26 = vpop.f32.mrb[2].mxu1 }
 0x11d   :  { %v225_v27 = vadd.f32 %v521_v25, %v390_v16  ;;  %v257_v28 = vadd.f32 %v529_v26, %v390_v16  ;;  %v216_v29 = vpop.f32.mrb[3].mxu0  ;;  %v248_v30 = vpop.f32.mrb[3].mxu1  ;;  %v278_v33 = vmax.f32 %v222_v19, 0.0  ;;  %v286_v34 = vmax.f32 %v254_v20, 0.0 }
 0x11e   :  { %v217_v31 = vadd.f32 %v390_v16, %v216_v29  ;;  %v249_v32 = vadd.f32 %v390_v16, %v248_v30  ;;  %v276_v37 = vmax.f32 %v214_v23, 0.0  ;;  %v284_v38 = vmax.f32 %v246_v24, 0.0 }
 0x11f   :  { %v279_v35 = vmax.f32 %v225_v27, 0.0  ;;  %v287_v36 = vmax.f32 %v257_v28, 0.0 }
 0x120   :  { %v277_v39 = vmax.f32 %v217_v31, 0.0  ;;  %v285_v40 = vmax.f32 %v249_v32, 0.0 }
 0x121   :  { %v447_v41 = vpack.c.bf16 %v279_v35, %v278_v33  ;;  %v467_v42 = vpack.c.bf16 %v287_v36, %v286_v34 }
 0x122   :  { %v442_v43 = vpack.c.bf16 %v277_v39, %v276_v37  ;;  %v462_v44 = vpack.c.bf16 %v285_v40, %v284_v38  ;;  %v524_v45 = vpop.f32.mrb[4].mxu0  ;;  %v532_v46 = vpop.f32.mrb[4].mxu1 }
 0x123   :  { %479 = vst [vmem:[#allocation7 + $0x8] sm:$0xff] %v447_v41   ;;  %483 = vst [vmem:[#allocation7 + $0x28] sm:$0xff] %v467_v42   ;;  %v238_v47 = vadd.f32 %v524_v45, %v390_v16  ;;  %v270_v48 = vadd.f32 %v532_v46, %v390_v16  ;;  %v229_v49 = vpop.f32.mrb[5].mxu0  ;;  %v261_v50 = vpop.f32.mrb[5].mxu1 }
 0x124   :  { %443 = vst [vmem:[#allocation7] sm:$0xff] %v442_v43   ;;  %482 = vst [vmem:[#allocation7 + $0x20] sm:$0xff] %v462_v44   ;;  %v230_v51 = vadd.f32 %v390_v16, %v229_v49  ;;  %v262_v52 = vadd.f32 %v390_v16, %v261_v50  ;;  %v525_v53 = vpop.f32.mrb[6].mxu0  ;;  %v533_v54 = vpop.f32.mrb[6].mxu1 }
 0x125   :  { %v241_v55 = vadd.f32 %v525_v53, %v390_v16  ;;  %v273_v56 = vadd.f32 %v533_v54, %v390_v16  ;;  %v232_v57 = vpop.f32.mrb[7].mxu0  ;;  %v264_v58 = vpop.f32.mrb[7].mxu1  ;;  %v282_v61 = vmax.f32 %v238_v47, 0.0  ;;  %v290_v62 = vmax.f32 %v270_v48, 0.0 }
 0x126   :  { %v233_v59 = vadd.f32 %v390_v16, %v232_v57  ;;  %v265_v60 = vadd.f32 %v390_v16, %v264_v58  ;;  %v280_v1 = vmax.f32 %v230_v51, 0.0  ;;  %v288_v2 = vmax.f32 %v262_v52, 0.0 }
 0x127   :  { %v283_v63 = vmax.f32 %v241_v55, 0.0  ;;  %v291_v0 = vmax.f32 %v273_v56, 0.0 }
 0x128   :  { %v281_v3 = vmax.f32 %v233_v59, 0.0  ;;  %v289_v4 = vmax.f32 %v265_v60, 0.0 }
 0x129   :  { %v457_v5 = vpack.c.bf16 %v283_v63, %v282_v61  ;;  %v477_v6 = vpack.c.bf16 %v291_v0, %v290_v62 }
 0x12a   :  { %v452_v7 = vpack.c.bf16 %v281_v3, %v280_v1  ;;  %v472_v8 = vpack.c.bf16 %v289_v4, %v288_v2 }
 0x12b   :  { %481 = vst [vmem:[#allocation7 + $0x18] sm:$0xff] %v457_v5   ;;  %485 = vst [vmem:[#allocation7 + $0x38] sm:$0xff] %v477_v6  }
 0x12c   :  { %480 = vst [vmem:[#allocation7 + $0x10] sm:$0xff] %v452_v7   ;;  %484 = vst [vmem:[#allocation7 + $0x30] sm:$0xff] %v472_v8  }
 0x12d   :  { %626 = shalt.err (!%p623_p6)
}
 0x12e   :  { %s627_s15 = scalar_lea.hbm %s719_s3, 1024 }
 0x12f   :  { %p628_p7 = scmp.ne.s32.totalorder %s719_s3, %s627_s15  ;;  %p631_p8 = scmp.lt.u32.totalorder %s627_s15, %s719_s3 }
 0x131   :  { %p633_p9 = pnand %p631_p8, %p628_p7 }
 0x133   :  { %636 = shalt.err (!%p633_p9)
}
 0x134   :  { %383 = dma.vmem_to_hbm [thread:$0]  %s378_s11, 1024, %s719_s3, [#allocation4], %s644_s22, %s644_s22, %s645_s23  }
 0x135   :  { %641 = dma.done.wait [#allocation4], 1024  }
 0x136   :  { %642 = vsyncadd [#allocation4], 4294966272 }
 0x137   :  { %387 = vsyncpa [#allocation3], 1 }
 0x138   :  { %388 = vsyncpa [#allocation6], 1 }
 0x139   :  { %389 = vsyncpa [#allocation4], 1 }

</bundles_post_ra>
